<compile_context>
chip_gen: v7x
topology: tpu7x:2x2x1
jax: 0.10.0
libtpu: 0.0.40
codegen_flags: <defaults>
</compile_context>

<pallas_src>
import functools

import jax
import jax.numpy as jnp
from jax.experimental import pallas as pl
from jax.experimental.pallas import tpu as pltpu

LANE = 128


def _round_up(x, m):
    return ((x + m - 1) // m) * m


def _linear_kernel(x_ref, w_ref, b_ref, m_ref, o_ref):
    """One row-tile of  y = (x @ w + b) * mask.

    x_ref: (TM, n_mels)        VMEM tile of flattened (time-major) inputs
    w_ref: (n_mels, n_pad)     weight, transposed + lane-padded to 128
    b_ref: (1, n_pad)          bias row, lane-padded
    m_ref: (TM, 1)             per-row validity (1.0 valid, 0.0 padded step)
    o_ref: (TM, n_pad)         output tile (lane-dense, full 128-wide stores)
    """
    acc = jnp.dot(x_ref[...], w_ref[...], preferred_element_type=jnp.float32)
    acc = (acc + b_ref[...].astype(jnp.float32)) * m_ref[...].astype(jnp.float32)
    o_ref[...] = acc.astype(o_ref.dtype)


def prepare_linear_params(weight, bias):
    """Hoist the torch-layout -> kernel-layout conversion out of the hot path.

    weight: (vocab, n_mels) torch nn.Linear layout
    bias:   (vocab,)
    Returns (w_pad, b_pad) with w_pad (n_mels, n_pad), b_pad (1, n_pad),
    n_pad = round_up(vocab, 128); padded columns are zero.
    """
    vocab, n_mels = weight.shape
    n_pad = _round_up(vocab, LANE)
    w_pad = jnp.zeros((n_mels, n_pad), weight.dtype).at[:, :vocab].set(weight.T)
    b_pad = jnp.zeros((1, n_pad), bias.dtype).at[:, :vocab].set(bias)
    return w_pad, b_pad


@functools.partial(jax.jit, static_argnames=("vocab_size", "row_tile"))
def linear_model_forward(padded_inputs, lengths, w_pad, b_pad, *,
                         vocab_size, row_tile=256):
    """Pallas implementation of LinearModel.forward.

    Args:
      padded_inputs: (T, B, n_mels), time-major padded batch (f32 or bf16).
      lengths:       (B,) valid lengths per batch element.
      w_pad, b_pad:  output of prepare_linear_params (lane-padded weights).
      vocab_size:    true vocab size (static) -- columns beyond it are padding.
      row_tile:      target number of flattened (t, b) rows per grid step.
    Returns:
      (padded_outputs, lengths): padded_outputs is (T, B, vocab_size) with
      timesteps beyond each sequence length zeroed (those rows would not be
      part of the PackedSequence PyTorch returns).
    """
    T, B, n_mels = padded_inputs.shape
    n_pad = w_pad.shape[1]
    rows = T * B

    # Row-tile selection: as large as requested, multiple of 8 (sublanes),
    # and at least 2 grid steps when possible so both v7x TensorCores work.
    tm = min(row_tile, _round_up(rows, 8))
    if pl.cdiv(rows, tm) < 2 and rows > 8:
        tm = _round_up(pl.cdiv(rows, 2), 8)
    grid = (pl.cdiv(rows, tm),)

    x2d = padded_inputs.reshape(rows, n_mels)

    # Per-row validity of the packed sequence.  Flattening is time-major:
    # row = t * B + b, so validity is (t < lengths[b]) broadcast over (T, B).
    valid = jnp.arange(T, dtype=jnp.int32)[:, None] < lengths[None, :].astype(jnp.int32)
    mask = valid.astype(padded_inputs.dtype).reshape(rows, 1)

    itemsize = jnp.dtype(padded_inputs.dtype).itemsize
    cost = pl.CostEstimate(
        flops=2 * rows * n_mels * n_pad,
        transcendentals=0,
        bytes_accessed=(rows * n_mels + n_mels * n_pad + rows * n_pad + rows) * itemsize,
    )

    out2d = pl.pallas_call(
        _linear_kernel,
        out_shape=jax.ShapeDtypeStruct((rows, n_pad), padded_inputs.dtype),
        grid_spec=pltpu.PrefetchScalarGridSpec(
            num_scalar_prefetch=0,
            grid=grid,
            in_specs=[
                pl.BlockSpec((tm, n_mels), lambda i: (i, 0)),
                pl.BlockSpec((n_mels, n_pad), lambda i: (0, 0)),
                pl.BlockSpec((1, n_pad), lambda i: (0, 0)),
                pl.BlockSpec((tm, 1), lambda i: (i, 0)),
            ],
            out_specs=pl.BlockSpec((tm, n_pad), lambda i: (i, 0)),
        ),
        compiler_params=pltpu.CompilerParams(
            dimension_semantics=("parallel",)),
        cost_estimate=cost,
    )(x2d, w_pad, b_pad, mask)

    out = out2d[:, :vocab_size].reshape(T, B, vocab_size)
    return out, lengths


def _torch_style_linear_init(key, out_features, in_features):
    """Deterministic re-implementation of nn.Linear default init."""
    kw, kb = jax.random.split(key)
    bound = 1.0 / jnp.sqrt(in_features)
    weight = jax.random.uniform(
        kw, (out_features, in_features), jnp.float32, -bound, bound)
    bias = jax.random.uniform(
        kb, (out_features,), jnp.float32, -bound, bound)
    return weight, bias


if __name__ == "__main__":
    key = jax.random.PRNGKey(0)
    k_x, k_p = jax.random.split(key)

    # Small shapes consistent with the module: seq T=8, batch B=2,
    # n_mels=32 input mel features, vocab_size=29 (typical CTC charmap).
    T, B, n_mels, vocab_size = 8, 2, 32, 29

    padded_inputs = jax.random.normal(k_x, (T, B, n_mels), jnp.float32)
    lengths = jnp.array([8, 5], dtype=jnp.int32)  # sorted desc (enforce_sorted)

    weight, bias = _torch_style_linear_init(k_p, vocab_size, n_mels)
    # Layout conversion (transpose + lane-pad) done once, outside jit.
    w_pad, b_pad = prepare_linear_params(weight, bias)

    out, out_lens = linear_model_forward(
        padded_inputs, lengths, w_pad, b_pad, vocab_size=vocab_size)
    out = jax.block_until_ready(out)

    # Cross-check against a pure-JAX reference of the same math.
    ref = padded_inputs @ weight.T + bias
    t_idx = jnp.arange(T)[:, None]
    ref = jnp.where((t_idx < lengths[None, :])[..., None], ref, 0.0)
    assert out.shape == (T, B, vocab_size)
    assert jnp.allclose(out, ref, atol=1e-5, rtol=1e-5)

    print("KERNEL_OK")
</pallas_src>

<mosaic_0001>
module attributes {stable_mosaic.version = 11 : i64} {
  func.func @_linear_kernel(%arg0: i32, %arg1: memref<8x32xf32, #tpu.memory_space<vmem>>, %arg2: memref<32x128xf32, #tpu.memory_space<vmem>>, %arg3: memref<1x128xf32, #tpu.memory_space<vmem>>, %arg4: memref<8x1xf32, #tpu.memory_space<vmem>>, %arg5: memref<8x128xf32, #tpu.memory_space<vmem>>) attributes {dimension_semantics = [#tpu.dimension_semantics<parallel>], iteration_bounds = array<i64: 2>, scalar_prefetch = 0 : i64, scratch_operands = 0 : i64, tpu.core_type = #tpu.core_type<tc>, window_params = [{transform_indices = @transform_0, window_bounds = array<i64: 8, 32>}, {pipeline_mode = #tpu.pipeline_mode<synchronous>, transform_indices = @transform_1, window_bounds = array<i64: 32, 128>}, {pipeline_mode = #tpu.pipeline_mode<synchronous>, transform_indices = @transform_2, window_bounds = array<i64: 1, 128>}, {transform_indices = @transform_3, window_bounds = array<i64: 8, 1>}, {transform_indices = @transform_4, window_bounds = array<i64: 8, 128>}]} {
    %c0 = arith.constant 0 : index
    %c0_0 = arith.constant 0 : index
    %0 = vector.load %arg1[%c0, %c0_0] : memref<8x32xf32, #tpu.memory_space<vmem>>, vector<8x32xf32>
    %c0_1 = arith.constant 0 : index
    %c0_2 = arith.constant 0 : index
    %1 = vector.load %arg2[%c0_1, %c0_2] : memref<32x128xf32, #tpu.memory_space<vmem>>, vector<32x128xf32>
    %cst = arith.constant dense<0.000000e+00> : vector<8x128xf32>
    %2 = tpu.matmul %0, %1, %cst {dimension_numbers = #tpu.dot_dimension_numbers<[1], [0], [0], [1], [0, 0, 1, 1], [], []>} : vector<8x32xf32>, vector<32x128xf32>, vector<8x128xf32> -> vector<8x128xf32>
    %c0_3 = arith.constant 0 : index
    %c0_4 = arith.constant 0 : index
    %3 = vector.load %arg3[%c0_3, %c0_4] : memref<1x128xf32, #tpu.memory_space<vmem>>, vector<1x128xf32>
    %4 = vector.broadcast %3 : vector<1x128xf32> to vector<8x128xf32>
    %5 = arith.addf %2, %4 : vector<8x128xf32>
    %c0_5 = arith.constant 0 : index
    %c0_6 = arith.constant 0 : index
    %6 = vector.load %arg4[%c0_5, %c0_6] : memref<8x1xf32, #tpu.memory_space<vmem>>, vector<8x1xf32>
    %7 = vector.broadcast %6 : vector<8x1xf32> to vector<8x128xf32>
    %8 = arith.mulf %5, %7 : vector<8x128xf32>
    %c0_7 = arith.constant 0 : index
    %c0_8 = arith.constant 0 : index
    %9 = vector.load %arg5[%c0_7, %c0_8] : memref<8x128xf32, #tpu.memory_space<vmem>>, vector<8x128xf32>
    tpu.vector_store %arg5[%c0_7, %c0_8], %8 {strides = array<i32>} : memref<8x128xf32, #tpu.memory_space<vmem>>, vector<8x128xf32>,
    return
  }
  func.func @transform_0(%arg0: i32) -> (i32, i32) {
    %c0_i32 = arith.constant 0 : i32
    %c0_i32_0 = arith.constant 0 : i32
    return %arg0, %c0_i32 : i32, i32
  }
  func.func @transform_1(%arg0: i32) -> (i32, i32) {
    %c0_i32 = arith.constant 0 : i32
    %c0_i32_0 = arith.constant 0 : i32
    %c0_i32_1 = arith.constant 0 : i32
    return %c0_i32, %c0_i32_0 : i32, i32
  }
  func.func @transform_2(%arg0: i32) -> (i32, i32) {
    %c0_i32 = arith.constant 0 : i32
    %c0_i32_0 = arith.constant 0 : i32
    %c0_i32_1 = arith.constant 0 : i32
    return %c0_i32, %c0_i32_0 : i32, i32
  }
  func.func @transform_3(%arg0: i32) -> (i32, i32) {
    %c0_i32 = arith.constant 0 : i32
    %c0_i32_0 = arith.constant 0 : i32
    return %arg0, %c0_i32 : i32, i32
  }
  func.func @transform_4(%arg0: i32) -> (i32, i32) {
    %c0_i32 = arith.constant 0 : i32
    %c0_i32_0 = arith.constant 0 : i32
    return %arg0, %c0_i32 : i32, i32
  }
}

</mosaic_0001>

<bundles_post_ra>
// kernel: linear_model_forward.1
= control target key start
LH: loop header
LB: loop body
LE: loop exit
PB: predicated region body
PF: predicated region fallthrough
CT: control target
= control target key end

     0   :  { %9 = vsyncpa [#allocation3], 0  ;;  %s822_s0 = inlined_call_operand.hbm [shape: f32[16,32], index: 0, kind: input, shape index: {}]   ;;  %s823_s1 = inlined_call_operand.vmem [shape: f32[32,128], index: 1, kind: input, shape index: {}]   ;;  %s824_s2 = inlined_call_operand.vmem [shape: f32[1,128], index: 2, kind: input, shape index: {}]   ;;  %s825_s3 = inlined_call_operand.vmem [shape: f32[16,1], index: 3, kind: input, shape index: {}]   ;;  %s826_s4 = inlined_call_operand.hbm [shape: f32[16,128], index: 4, kind: output, shape index: {}]  }
   0x1   :  { %11 = vsyncpa [#allocation3 + $0x1], 0 }
   0x2   :  { %12 = vsyncpa [#allocation4], 0 }
   0x3   :  { %14 = vsyncpa [#allocation4 + $0x1], 0  ;;  %s637_s15 = smov 0   ;;  %s639_s16 = smov 0  }
   0x4   :  { %s641_s17 = smov 0   ;;  %s643_s18 = smov 0  }
   0x5 LB: > { %s658_s19 = sadd.s32 4294967295, %s604_s18   ;;  %s420_s20 = sadd.s32 4294967294, %s604_s18   ;;  %s604_s18 = sphi %s643_s18, %s841_s18   ;;  %s600_s17 = sphi %s641_s17, %s840_s17   ;;  %s596_s16 = sphi %s639_s16, %s839_s16   ;;  %s592_s15 = sphi %s637_s15, %s838_s15  }
   0x6   : > { %s662_s21 = sadd.s32 1, %s604_s18   ;;  %s27_s22 = sadd.s32 1, %s600_s17 }
   0x7   : > { %s24_s23 = ssub.s32 %s604_s18, %s662_s21  ;;  %p34_p0 = scmp.ne.s32.totalorder %s600_s17, %s596_s16 }
   0x8   : > { %p25_p1 = scmp.eq.s32.totalorder %s24_s23, 0  ;;  %p35_p2 = scmp.eq.s32.totalorder %s604_s18, 0 }
   0x9   : > { %p40_p3 = scmp.ne.s32.totalorder %s596_s16, %s592_s15  ;;  %p41_p4 = scmp.eq.s32.totalorder %s658_s19, 0 }
   0xa   : > { %s674_s24 = scalar_select %p25_p1, %s600_s17, %s27_s22  }
   0xb   : > { %p676_p5 = por %p35_p2, %p34_p0  ;;  %p680_p6 = por %p41_p4, %p40_p3 }
   0xc   : > { %p132_p7 = scmp.eq.s32.totalorder %s658_s19, 1  ;;  %p138_p8 = scmp.eq.s32.totalorder %s420_s20, 1 }
   0xd   : > { %p469_p10 = scmp.lt.s32.totalorder %s604_s18, 2  ;;  %s164_s29 = sand.u32 1, %s600_s17  }
   0xe   : > { %p687_p11 = por %p132_p7, %p34_p0  ;;  %p691_p12 = por %p138_p8, %p40_p3 }
   0xf   : > { %s424_s30 = sshll.u32 %s604_s18, 7  ;;  %s423_s5 = sshll.u32 %s164_s29, 3 }
  0x10   : > { %s830_s27 = scalar_select %p687_p11, 1, 0 }
  0x11   : > { %s831_s28 = scalar_select %p691_p12, 1, 0 }
  0x12   : > { %s700_s8 = scalar_lea.hbm %s822_s0, %s424_s30  ;;  %s168_s9 = scalar_lea.vmem [#allocation2], %s423_s5 }
  0x13   : > { %s175_s10 = sshll.u32 %s168_s9, 4  ;;  %p704_p13 = pnand %p469_p10, %p676_p5  ;;  %s708_s10 = int_to_ptr.vmem [resolvable:$true] %s175_s10 }
  0x14   : > { %s165_s12 = scalar_lea.sflag [#allocation3], %s164_s29  ;;  %s508_s13 = scalar_lea.hbm %s700_s8, 128 }
  0x15   : > { %p509_p2 = scmp.ne.s32.totalorder %s700_s8, %s508_s13  ;;  %p510_p3 = pneg %p704_p13 }
  0x16   : > { %s513_s22 = scalar_lea.hbm %s822_s0, 256  ;;  %p514_p5 = scmp.lt.u32.totalorder %s700_s8, %s822_s0 }
  0x17   : > { %p511_p4 = pnand %p510_p3, %p509_p2  ;;  %p515_p8 = scmp.lt.u32.totalorder %s513_s22, %s508_s13 }
  0x18   : > { %p517_p9 = scmp.lt.u32.totalorder %s508_s13, %s700_s8 }
  0x19   : > { %p512_p7 = pneg %p511_p4  ;;  %p516_p10 = por %p515_p8, %p514_p5 }
  0x1b   : > { %p518_p0 = por %p517_p9, %p516_p10 }
  0x1d   : > { %p519_p1 = pnand %p518_p0, %p512_p7 }
  0x1f   : > { %522 = shalt.err (!%p519_p1)
}
  0x20   : > { %s523_s29 = scalar_lea.vmem %s708_s10, 128  ;;  %s606_s30 = smov [#allocation2]  }
  0x21   : > { %p524_p2 = scmp.ne.s32.totalorder %s708_s10, %s523_s29  ;;  %s528_s5 = sshll.u32 %s606_s30, 4  ;;  %s529_s5 = int_to_ptr.vmem [resolvable:$false] %s528_s5 }
  0x22   : > { %s530_s6 = scalar_lea.vmem %s529_s5, 256  ;;  %p531_p11 = scmp.lt.s32.totalorder %s708_s10, %s529_s5 }
  0x23   : > { %p526_p4 = pnand %p524_p2, %p510_p3  ;;  %p532_p5 = scmp.lt.s32.totalorder %s530_s6, %s523_s29 }
  0x25   : > { %p527_p12 = pneg %p526_p4  ;;  %p533_p8 = por %p532_p5, %p531_p11 }
  0x27   : > { %p534_p9 = pnand %p533_p8, %p527_p12 }
  0x29   : > { %537 = shalt.err (!%p534_p9)
}
  0x2a   : > { %464 = dma.hbm_to_vmem [thread:$0]  (!%p704_p13), %s700_s8, 128, %s708_s10, %s165_s12  }
  0x2b   : > { %p833_p0 = scmp.lt.s32.totalorder %s604_s18, 3  ;;  %p834_p1 = scmp.ge.s32.totalorder %s604_s18, 1 }
  0x2d   : > { %p188_p3 = pnand %p834_p1, %p833_p0 }
  0x2e   : > { %s742_s7 = sand.u32 (!%p188_p3), 1, %s596_s16  }
  0x2f   : > { %191 = sbr.rel (%p188_p3) target bundleno = 296 (0x128), region = 36  ;;  %s426_s9 = sshll.u32 (!%p188_p3), %s742_s7, 3 }
  0x30   : > { %s194_s13 = scalar_lea.sflag (!%p188_p3), [#allocation3], %s742_s7  ;;  %s197_s11 = scalar_lea.vmem (!%p188_p3), [#allocation2], %s426_s9 }
  0x36   : > { %583 = dma.done.wait (%p680_p6), %s194_s13, 128  }
  0x37   : > { %585 = vsyncadd (%p680_p6), %s194_s13, 4294967168  ;;  %p226_p11 = scmp.lt.s32.totalorder %s658_s19, 1  ;;  %v607_v0 = vmov 0.0|0.0   ;;  %vm608_vm0 = vmmov 0   ;;  %v609_v1 = vmov 0.0   ;;  %v610_v2 = vmov 0  }
  0x38   : > { %451 = vmatprep.subr.bf16.mxu0 %v607_v0  ;;  %448 = vmatprep.mubr.msk.f32.mxu0 %vm608_vm0, %v609_v1  ;;  %v231_v3 = vld [vmem:[%s823_s1] sm:$0xff]  ;;  %v232_v4 = vld [vmem:[%s823_s1 + $0x8] sm:$0xff]  ;;  %v233_v5 = vld [vmem:[%s823_s1 + $0x10] sm:$0xff]  ;;  %vm242_vm1 = vcmask 261120   ;;  %s225_s12 = scalar_lea.vmem [#allocation5], %s426_s9  ;;  %s325_s23 = scalar_lea.sflag [#allocation4], %s742_s7 }
  0x39   : > { %507 = vset.pattern.permute.xlu0 %v610_v2  ;;  %s227_s8 = scalar_select %p226_p11, %s658_s19, 1  ;;  %v452_v6 = vpack.c.bf16 %v232_v4, %v231_v3  ;;  %v234_v7 = vld [vmem:[%s823_s1 + $0x18] sm:$0xff]  ;;  %v230_v10 = vld [vmem:[%s197_s11] sm:$0xff] }
  0x3a   : > { %v455_v9 = vpack.c.bf16 %v234_v7, %v233_v5  ;;  %v429_v11 = vld [vmem:[%s824_s2] ss:$0 sm:$0xff]  ;;  %s338_s14 = sshll.u32 %s225_s12, 4  ;;  %p835_p12 = scmp.ne.s32.totalorder %s830_s27, 0  ;;  %s780_s14 = int_to_ptr.vmem [resolvable:$true] %s338_s14 }
  0x3b   : > { %s428_s10 = sshll.u32 %s227_s8, 3  ;;  %453 = vmatpush3.bf16.msra.mxu0 %v452_v6  ;;  %s538_s26 = scalar_lea.vmem %s780_s14, 128 }
  0x3c   : > { %s229_s20 = scalar_lea.vmem %s825_s3, %s428_s10  ;;  %454 = vmatprep.subr.bf16.mxu0 %v607_v0  ;;  %s432_s10 = sshll.u32 %s658_s19, 7 }
  0x3d   : > { %v316_v8 = vld [vmem:[%s229_s20] sm:$0xff]  ;;  %s778_s11 = scalar_lea.hbm %s826_s4, %s432_s10  ;;  %p539_p6 = scmp.ne.s32.totalorder %s780_s14, %s538_s26 }
  0x3e   : > { %319 = vperm.xlu0 %507, %v316_v8   ;;  %s611_s19 = smov [#allocation5]  }
  0x3f   : > { %456 = vmatpush3.bf16.msra.mxu0 %v455_v9  ;;  %p540_p13 = pnand %p539_p6, %p835_p12  ;;  %s542_s9 = sshll.u32 %s611_s19, 4  ;;  %s543_s9 = int_to_ptr.vmem [resolvable:$false] %s542_s9 }
  0x40   : > { %s544_s25 = scalar_lea.vmem %s543_s9, 256  ;;  %p545_p10 = scmp.lt.s32.totalorder %s780_s14, %s543_s9 }
  0x41   : > { %p541_p7 = pneg %p540_p13  ;;  %p546_p2 = scmp.lt.s32.totalorder %s544_s25, %s538_s26 }
  0x42   : > { %449 = vmatmul.mubr.msk.f32.vlgmr.msra.gmra.mrb[0].mxu0 %vm242_vm1, %v230_v10 }
  0x43   : > { %p547_p4 = por %p546_p2, %p545_p10 }
  0x45   : > { %p548_p5 = pnand %p547_p4, %p541_p7 }
  0xbd   : > { %v320_v13 = vpop.permute.xlu0 %319 }
 0x115   : > { %v312_v12 = vpop.f32.mrb[0].mxu0 }
 0x116   : > { %v313_v14 = vadd.f32 %v429_v11, %v312_v12  ;;  %v450_v15 = vpop.f32.mrb[1].mxu0 }
 0x118   : > { %v322_v16 = vmul.f32 %v320_v13, %v313_v14 }
 0x11a   : > { %323 = vst [vmem:[%s225_s12] sm:$0xff] %v322_v16 }
 0x11b   : > { %551 = shalt.err (!%p548_p5)
}
 0x11c   : > { %s552_s7 = scalar_lea.hbm %s778_s11, 128  ;;  %s556_s5 = scalar_lea.hbm %s826_s4, 256 }
 0x11d   : > { %p553_p8 = scmp.ne.s32.totalorder %s778_s11, %s552_s7  ;;  %p557_p1 = scmp.lt.u32.totalorder %s778_s11, %s826_s4 }
 0x11e   : > { %p558_p3 = scmp.lt.u32.totalorder %s556_s5, %s552_s7  ;;  %p560_p6 = scmp.lt.u32.totalorder %s552_s7, %s778_s11 }
 0x11f   : > { %p554_p9 = pnand %p553_p8, %p835_p12 }
 0x120   : > { %p559_p11 = por %p558_p3, %p557_p1 }
 0x121   : > { %p555_p0 = pneg %p554_p9 }
 0x122   : > { %p561_p13 = por %p560_p6, %p559_p11 }
 0x124   : > { %p562_p7 = pnand %p561_p13, %p555_p0 }
 0x126   : > { %565 = shalt.err (!%p562_p7)
}
 0x127   : > { %459 = dma.vmem_to_hbm [thread:$0]  (%p835_p12), %s780_s14, 128, %s778_s11, %s325_s23  }
 0x128 PF: > { %s350_s8 = sand.u32 1, %s592_s15   ;;  %p836_p10 = scmp.ne.s32.totalorder %s831_s28, 0 }
 0x129   : > { %p837_p2 = scmp.ge.s32.totalorder %s604_s18, 2  ;;  %s351_s10 = scalar_lea.sflag [#allocation4], %s350_s8 }
 0x12b   : > { %p466_p4 = pnand %p837_p2, %p836_p10 }
 0x12d   : > { %587 = dma.done.wait (!%p466_p4), %s351_s10, 128  }
 0x12e   : > { %589 = vsyncadd (!%p466_p4), %s351_s10, 4294967168  ;;  %p17_p5 = scmp.ge.s32.totalorder %s662_s21, 4   ;;  %s838_s15 = smov %s596_s16 }
 0x12f   : > { %s839_s16 = smov %s600_s17  ;;  %s840_s17 = smov %s674_s24 }
 0x130   : > { %s841_s18 = smov %s662_s21  ;;  %19 = sbr.rel (!%p17_p5) target bundleno = 5 (0x5), region = 84 }
 0x137   :  { %356 = vsyncpa [#allocation3], 1 }
 0x138   :  { %358 = vsyncpa [#allocation3 + $0x1], 1 }
 0x139   :  { %359 = vsyncpa [#allocation4], 1 }
 0x13a   :  { %361 = vsyncpa [#allocation4 + $0x1], 1 }

</bundles_post_ra>
